<compile_context>
chip_gen: v5e
topology: v5e:2x2
jax: 0.10.0
libtpu: 0.0.40
codegen_flags: <defaults>
</compile_context>

<pallas_src>
import functools

import jax
import jax.numpy as jnp
from jax import lax
from jax.experimental import pallas as pl
from jax.experimental.pallas import tpu as pltpu

LN_EPS = 1e-5


def _round_up(x, m):
    return (x + m - 1) // m * m


def _embed_ln_kernel(ids_ref, table_hbm, gamma_ref, beta_ref, out_ref, sems,
                     *, embed_dim, chunk):
    # ids_ref:   (N_pad,)     int32  SMEM (scalar prefetch) token ids
    # table_hbm: (V, LANES)   f32    HBM (pl.ANY): fused (table @ W.T + b), lane-padded
    # gamma_ref: (1, LANES)   f32    VMEM  LayerNorm weight (zero-padded)
    # beta_ref:  (1, LANES)   f32    VMEM  LayerNorm bias   (zero-padded)
    # out_ref:   (TN, LANES)  f32    VMEM  output block (also the gather destination)
    # sems:      (2,)                DMA completion semaphores, one per chunk parity
    tn, lanes = out_ref.shape
    n_chunks = tn // chunk
    base = pl.program_id(0) * tn

    def issue_chunk(ci, par):
        # One async copy per row; every row of the chunk signals sems[par].
        @pl.loop(0, chunk)
        def _(r):
            row = ci * chunk + r
            tok = ids_ref[base + row]
            pltpu.make_async_copy(
                table_hbm.at[pl.ds(tok, 1)],     # (1, LANES) row in HBM
                out_ref.at[pl.ds(row, 1)],       # (1, LANES) row of the output block
                sems.at[par]).start()

    def wait_chunk(par):
        # Shape-matched wait descriptors: one per outstanding row copy (all the
        # same size, so wait count == copy count drains the semaphore exactly).
        @pl.loop(0, chunk)
        def _(r):
            pltpu.make_async_copy(
                table_hbm.at[pl.ds(0, 1)],
                out_ref.at[pl.ds(0, 1)],
                sems.at[par]).wait()

    # Prologue: start the gather DMAs for chunk 0.
    issue_chunk(0, 0)

    # Loop invariants hoisted out of the chunk loop (JAX does not CSE broadcasts).
    gamma = gamma_ref[...]
    beta = beta_ref[...]
    inv_e = 1.0 / float(embed_dim)
    if embed_dim == lanes:
        valid = None
    else:
        lane_idx = lax.broadcasted_iota(jnp.int32, (chunk, lanes), 1)
        valid = lane_idx < embed_dim

    @pl.loop(0, n_chunks)
    def _(c):
        par = c % 2

        # Prefetch the next chunk's rows while this chunk is normalized.
        @pl.when(c + 1 < n_chunks)
        def _():
            issue_chunk(c + 1, 1 - par)

        wait_chunk(par)

        # Fused LayerNorm (+ affine) on this chunk, lane-dense, f32.
        off = pl.multiple_of(c * chunk, chunk)
        x = out_ref[pl.ds(off, chunk), :]                         # (chunk, LANES)
        mean = jnp.sum(x, axis=-1, keepdims=True) * inv_e         # pad lanes are zero
        centered = x - mean
        if valid is not None:
            centered = jnp.where(valid, centered, 0.0)
        var = jnp.sum(centered * centered, axis=-1, keepdims=True) * inv_e
        y = centered * lax.rsqrt(var + LN_EPS)
        out_ref[pl.ds(off, chunk), :] = (y * gamma + beta).astype(out_ref.dtype)


def squeezeformer_embedding(input_ids, table, w=None, b=None, gamma=None, beta=None,
                            *, tile_tokens=256, chunk_rows=64):
    """input_ids: (B, S) int; returns (B, S, E) float32 (embed_proj branch if w/b given)."""
    B, S = input_ids.shape
    V, E = table.shape
    N = B * S
    lanes = max(128, _round_up(E, 128))

    # --- one-time parameter prep in plain JAX (outside the hot kernel) -------
    # Algebraic fusion of the embed_proj Linear into the embedding table.
    fused = table.astype(jnp.float32)
    if w is not None:
        fused = fused @ w.astype(jnp.float32).T
    if b is not None:
        fused = fused + b.astype(jnp.float32)
    fused = jnp.pad(fused, ((0, 0), (0, lanes - E)))              # lane-pad with zeros
    gamma_p = jnp.pad(gamma.astype(jnp.float32), (0, lanes - E)).reshape(1, lanes)
    beta_p = jnp.pad(beta.astype(jnp.float32), (0, lanes - E)).reshape(1, lanes)

    # --- token tiling (ragged N handled by padding ids; pad rows are cheap) --
    tn = _round_up(min(tile_tokens, _round_up(N, 8)), 8)
    chunk = min(_round_up(chunk_rows, 8), tn)
    tn = _round_up(tn, chunk)
    n_pad = _round_up(N, tn)

    ids = jnp.clip(input_ids.reshape(-1).astype(jnp.int32), 0, V - 1)
    ids = jnp.pad(ids, (0, n_pad - N))

    kernel = functools.partial(_embed_ln_kernel, embed_dim=E, chunk=chunk)

    out = pl.pallas_call(
        kernel,
        out_shape=jax.ShapeDtypeStruct((n_pad, lanes), jnp.float32),
        grid_spec=pltpu.PrefetchScalarGridSpec(
            num_scalar_prefetch=1,                                 # ids -> SMEM
            grid=(n_pad // tn,),
            in_specs=[
                pl.BlockSpec(memory_space=pl.ANY),                 # fused table stays in HBM
                pl.BlockSpec((1, lanes), lambda i, ids_ref: (0, 0)),   # gamma (resident)
                pl.BlockSpec((1, lanes), lambda i, ids_ref: (0, 0)),   # beta  (resident)
            ],
            out_specs=pl.BlockSpec((tn, lanes), lambda i, ids_ref: (i, 0)),
            scratch_shapes=[
                pltpu.SemaphoreType.DMA((2,)),                     # per-parity chunk sems
            ],
        ),
        compiler_params=pltpu.CompilerParams(
            dimension_semantics=("parallel",)),
    )(ids, fused, gamma_p, beta_p)

    return out[:N, :E].reshape(B, S, E)


def _reference(input_ids, table, w, b, gamma, beta):
    x = table[input_ids]                       # (B, S, E) embedding gather
    x = x @ w.T + b                            # embed_proj
    mean = jnp.mean(x, axis=-1, keepdims=True)
    var = jnp.mean((x - mean) ** 2, axis=-1, keepdims=True)
    x = (x - mean) / jnp.sqrt(var + LN_EPS)
    return x * gamma + beta


if __name__ == "__main__":
    # Small shapes implied by the module: vocab=16, embed_dim=32, batch=2, seq=8.
    vocab_size, embed_dim = 16, 32
    B, S = 2, 8

    key = jax.random.PRNGKey(0)
    k_ids, k_tab, k_w, k_b, k_g, k_be = jax.random.split(key, 6)

    input_ids = jax.random.randint(k_ids, (B, S), 0, vocab_size, dtype=jnp.int32)

    # Deterministic synthetic parameters (shapes match the nn.Module __init__).
    table = jax.random.normal(k_tab, (vocab_size, embed_dim), jnp.float32)   # nn.Embedding
    w = jax.random.normal(k_w, (embed_dim, embed_dim), jnp.float32) * 0.1    # nn.Linear weight
    b = jax.random.normal(k_b, (embed_dim,), jnp.float32) * 0.1              # nn.Linear bias
    gamma = 1.0 + 0.1 * jax.random.normal(k_g, (embed_dim,), jnp.float32)    # LayerNorm weight
    beta = 0.1 * jax.random.normal(k_be, (embed_dim,), jnp.float32)          # LayerNorm bias

    out = squeezeformer_embedding(input_ids, table, w, b, gamma, beta)
    out = jax.block_until_ready(out)

    ref = _reference(input_ids, table, w, b, gamma, beta)
    assert out.shape == (B, S, embed_dim)
    assert jnp.allclose(out, ref, atol=1e-4, rtol=1e-4), "mismatch vs reference"

    print("KERNEL_OK")
</pallas_src>

<mosaic_0001>
module attributes {stable_mosaic.version = 11 : i64} {
  func.func @_embed_ln_kernel(%arg0: i32, %arg1: memref<16xi32, #tpu.memory_space<smem>>, %arg2: memref<16x128xf32, #tpu.memory_space<any>>, %arg3: memref<1x128xf32, #tpu.memory_space<vmem>>, %arg4: memref<1x128xf32, #tpu.memory_space<vmem>>, %arg5: memref<16x128xf32, #tpu.memory_space<vmem>>, %arg6: memref<2x!tpu.dma_semaphore, #tpu.memory_space<semaphore_mem>>) attributes {dimension_semantics = [#tpu.dimension_semantics<parallel>], iteration_bounds = array<i64: 1>, scalar_prefetch = 1 : i64, scratch_operands = 1 : i64, tpu.core_type = #tpu.core_type<tc>, window_params = [{}, {pipeline_mode = #tpu.pipeline_mode<synchronous>, transform_indices = @transform_1, window_bounds = array<i64: 1, 128>}, {pipeline_mode = #tpu.pipeline_mode<synchronous>, transform_indices = @transform_2, window_bounds = array<i64: 1, 128>}, {transform_indices = @transform_3, window_bounds = array<i64: 16, 128>}]} {
    %c16_i32 = arith.constant 16 : i32
    %0 = arith.muli %arg0, %c16_i32 : i32
    %c0_i32 = arith.constant 0 : i32
    %c16_i32_0 = arith.constant 16 : i32
    %1 = arith.addi %c0_i32, %c16_i32_0 : i32
    %c1_i32 = arith.constant 1 : i32
    scf.for %arg7 = %c0_i32 to %1 step %c1_i32  : i32 {
      %c1_i32_28 = arith.constant 1 : i32
      %52 = arith.muli %arg7, %c1_i32_28 : i32
      %c0_i32_29 = arith.constant 0 : i32
      %53 = arith.addi %c0_i32_29, %52 : i32
      %c0_i32_30 = arith.constant 0 : i32
      %54 = arith.addi %c0_i32_30, %53 : i32
      %55 = arith.addi %0, %54 : i32
      %56 = arith.index_cast %55 : i32 to index
      %57 = memref.load %arg1[%56] : memref<16xi32, #tpu.memory_space<smem>>
      %c0_i32_31 = arith.constant 0 : i32
      %c0_i32_32 = arith.constant 0 : i32
      %58 = tpu.memref_slice %arg2[%57, %c0_i32_32] : memref<16x128xf32, #tpu.memory_space<any>> -> memref<1x128xf32, #tpu.memory_space<any>>
      %c0_i32_33 = arith.constant 0 : i32
      %59 = tpu.memref_slice %arg5[%54, %c0_i32_33] : memref<16x128xf32, #tpu.memory_space<vmem>> -> memref<1x128xf32, #tpu.memory_space<vmem>>
      %60 = tpu.memref_slice %arg6[%c0_i32_31] : memref<2x!tpu.dma_semaphore, #tpu.memory_space<semaphore_mem>> -> memref<1x!tpu.dma_semaphore, #tpu.memory_space<semaphore_mem>>
      %61 = tpu.memref_squeeze %60 : memref<1x!tpu.dma_semaphore, #tpu.memory_space<semaphore_mem>> -> memref<!tpu.dma_semaphore, #tpu.memory_space<semaphore_mem>>
      tpu.enqueue_dma source(%58 : memref<1x128xf32, #tpu.memory_space<any>>) target(%59 : memref<1x128xf32, #tpu.memory_space<vmem>>) target_semaphore(%61 : memref<!tpu.dma_semaphore, #tpu.memory_space<semaphore_mem>>)
    }
    %c16_i32_1 = arith.constant 16 : i32
    %c0 = arith.constant 0 : index
    %c0_2 = arith.constant 0 : index
    %2 = vector.load %arg3[%c0, %c0_2] : memref<1x128xf32, #tpu.memory_space<vmem>>, vector<1x128xf32>
    %c0_3 = arith.constant 0 : index
    %c0_4 = arith.constant 0 : index
    %3 = vector.load %arg4[%c0_3, %c0_4] : memref<1x128xf32, #tpu.memory_space<vmem>>, vector<1x128xf32>
    %4 = tpu.iota {dimensions = array<i32: 1>} : vector<16x128xi32>
    %c32_i32 = arith.constant 32 : i32
    %5 = vector.broadcast %c32_i32 : i32 to vector<16x128xi32>
    %6 = arith.cmpi slt, %4, %5 : vector<16x128xi32>
    %c0_i32_5 = arith.constant 0 : i32
    %c1_i32_6 = arith.constant 1 : i32
    %7 = arith.muli %c0_i32_5, %c1_i32_6 : i32
    %c0_i32_7 = arith.constant 0 : i32
    %8 = arith.addi %c0_i32_7, %7 : i32
    %c2_i32 = arith.constant 2 : i32
    %c0_i32_8 = arith.constant 0 : i32
    %9 = arith.cmpi eq, %c2_i32, %c0_i32_8 : i32
    %c1_i32_9 = arith.constant 1 : i32
    %10 = arith.select %9, %c1_i32_9, %c2_i32 : i32
    %11 = arith.remsi %8, %10 : i32
    %c0_i32_10 = arith.constant 0 : i32
    %12 = arith.cmpi ne, %11, %c0_i32_10 : i32
    %c0_i32_11 = arith.constant 0 : i32
    %13 = arith.cmpi slt, %11, %c0_i32_11 : i32
    %c0_i32_12 = arith.constant 0 : i32
    %14 = arith.cmpi slt, %10, %c0_i32_12 : i32
    %15 = arith.xori %13, %14 : i1
    %16 = arith.andi %15, %12 : i1
    %17 = arith.addi %11, %10 : i32
    %18 = arith.select %16, %17, %11 : i32
    %c1_i32_13 = arith.constant 1 : i32
    %19 = arith.addi %8, %c1_i32_13 : i32
    %c1_i32_14 = arith.constant 1 : i32
    %20 = arith.cmpi slt, %19, %c1_i32_14 : i32
    %21 = arith.extui %20 : i1 to i32
    %c0_i32_15 = arith.constant 0 : i32
    %22 = arith.cmpi ne, %21, %c0_i32_15 : i32
    scf.if %22 {
      %c1_i32_28 = arith.constant 1 : i32
      %52 = arith.addi %8, %c1_i32_28 : i32
      %c1_i32_29 = arith.constant 1 : i32
      %53 = arith.subi %c1_i32_29, %18 : i32
      %c0_i32_30 = arith.constant 0 : i32
      %c16_i32_31 = arith.constant 16 : i32
      %54 = arith.addi %c0_i32_30, %c16_i32_31 : i32
      %c1_i32_32 = arith.constant 1 : i32
      scf.for %arg7 = %c0_i32_30 to %54 step %c1_i32_32  : i32 {
        %c1_i32_34 = arith.constant 1 : i32
        %55 = arith.muli %arg7, %c1_i32_34 : i32
        %c0_i32_35 = arith.constant 0 : i32
        %56 = arith.addi %c0_i32_35, %55 : i32
        %c16_i32_36 = arith.constant 16 : i32
        %57 = arith.muli %52, %c16_i32_36 : i32
        %58 = arith.addi %57, %56 : i32
        %59 = arith.addi %0, %58 : i32
        %60 = arith.index_cast %59 : i32 to index
        %61 = memref.load %arg1[%60] : memref<16xi32, #tpu.memory_space<smem>>
        %c0_i32_37 = arith.constant 0 : i32
        %62 = tpu.memref_slice %arg2[%61, %c0_i32_37] : memref<16x128xf32, #tpu.memory_space<any>> -> memref<1x128xf32, #tpu.memory_space<any>>
        %c0_i32_38 = arith.constant 0 : i32
        %63 = tpu.memref_slice %arg5[%58, %c0_i32_38] : memref<16x128xf32, #tpu.memory_space<vmem>> -> memref<1x128xf32, #tpu.memory_space<vmem>>
        %64 = tpu.memref_slice %arg6[%53] : memref<2x!tpu.dma_semaphore, #tpu.memory_space<semaphore_mem>> -> memref<1x!tpu.dma_semaphore, #tpu.memory_space<semaphore_mem>>
        %65 = tpu.memref_squeeze %64 : memref<1x!tpu.dma_semaphore, #tpu.memory_space<semaphore_mem>> -> memref<!tpu.dma_semaphore, #tpu.memory_space<semaphore_mem>>
        tpu.enqueue_dma source(%62 : memref<1x128xf32, #tpu.memory_space<any>>) target(%63 : memref<1x128xf32, #tpu.memory_space<vmem>>) target_semaphore(%65 : memref<!tpu.dma_semaphore, #tpu.memory_space<semaphore_mem>>)
      }
      %c16_i32_33 = arith.constant 16 : i32
    } else {
    }
    %c0_i32_16 = arith.constant 0 : i32
    %c16_i32_17 = arith.constant 16 : i32
    %23 = arith.addi %c0_i32_16, %c16_i32_17 : i32
    %c1_i32_18 = arith.constant 1 : i32
    scf.for %arg7 = %c0_i32_16 to %23 step %c1_i32_18  : i32 {
      %c0_i32_28 = arith.constant 0 : i32
      %c0_i32_29 = arith.constant 0 : i32
      %52 = tpu.memref_slice %arg2[%c0_i32_28, %c0_i32_29] : memref<16x128xf32, #tpu.memory_space<any>> -> memref<1x128xf32, #tpu.memory_space<any>>
      %c0_i32_30 = arith.constant 0 : i32
      %c0_i32_31 = arith.constant 0 : i32
      %53 = tpu.memref_slice %arg5[%c0_i32_30, %c0_i32_31] : memref<16x128xf32, #tpu.memory_space<vmem>> -> memref<1x128xf32, #tpu.memory_space<vmem>>
      %54 = tpu.memref_slice %arg6[%18] : memref<2x!tpu.dma_semaphore, #tpu.memory_space<semaphore_mem>> -> memref<1x!tpu.dma_semaphore, #tpu.memory_space<semaphore_mem>>
      %55 = tpu.memref_squeeze %54 : memref<1x!tpu.dma_semaphore, #tpu.memory_space<semaphore_mem>> -> memref<!tpu.dma_semaphore, #tpu.memory_space<semaphore_mem>>
      tpu.wait_dma2 semaphore(%55 : memref<!tpu.dma_semaphore, #tpu.memory_space<semaphore_mem>>) src(%52 : memref<1x128xf32, #tpu.memory_space<any>>) dst(%53 : memref<1x128xf32, #tpu.memory_space<vmem>>)
    }
    %c16_i32_19 = arith.constant 16 : i32
    %24 = arith.muli %8, %c16_i32_19 : i32
    %25 = tpu.assume_multiple %24, 16 : i32
    %26 = arith.index_cast %25 : i32 to index
    %c0_20 = arith.constant 0 : index
    %27 = vector.load %arg5[%26, %c0_20] : memref<16x128xf32, #tpu.memory_space<vmem>>, vector<16x128xf32>
    %cst = arith.constant dense<0.000000e+00> : vector<16xf32>
    %28 = vector.multi_reduction <add>, %27, %cst [1] : vector<16x128xf32> to vector<16xf32>
    %29 = vector.shape_cast %28 : vector<16xf32> to vector<16x1xf32>
    %cst_21 = arith.constant 3.125000e-02 : f32
    %30 = vector.broadcast %cst_21 : f32 to vector<16x1xf32>
    %31 = arith.mulf %29, %30 : vector<16x1xf32>
    %32 = vector.broadcast %31 : vector<16x1xf32> to vector<16x128xf32>
    %33 = arith.subf %27, %32 : vector<16x128xf32>
    %cst_22 = arith.constant 0.000000e+00 : f32
    %34 = vector.broadcast %cst_22 : f32 to vector<16x128xf32>
    %35 = arith.select %6, %33, %34 : vector<16x128xi1>, vector<16x128xf32>
    %36 = arith.mulf %35, %35 : vector<16x128xf32>
    %cst_23 = arith.constant dense<0.000000e+00> : vector<16xf32>
    %37 = vector.multi_reduction <add>, %36, %cst_23 [1] : vector<16x128xf32> to vector<16xf32>
    %38 = vector.shape_cast %37 : vector<16xf32> to vector<16x1xf32>
    %cst_24 = arith.constant 3.125000e-02 : f32
    %39 = vector.broadcast %cst_24 : f32 to vector<16x1xf32>
    %40 = arith.mulf %38, %39 : vector<16x1xf32>
    %cst_25 = arith.constant 9.99999974E-6 : f32
    %41 = vector.broadcast %cst_25 : f32 to vector<16x1xf32>
    %42 = arith.addf %40, %41 : vector<16x1xf32>
    %43 = math.rsqrt %42 : vector<16x1xf32>
    %44 = vector.broadcast %43 : vector<16x1xf32> to vector<16x128xf32>
    %45 = arith.mulf %35, %44 : vector<16x128xf32>
    %46 = vector.broadcast %2 : vector<1x128xf32> to vector<16x128xf32>
    %47 = arith.mulf %45, %46 : vector<16x128xf32>
    %48 = vector.broadcast %3 : vector<1x128xf32> to vector<16x128xf32>
    %49 = arith.addf %47, %48 : vector<16x128xf32>
    %50 = arith.index_cast %25 : i32 to index
    %c0_26 = arith.constant 0 : index
    %51 = vector.load %arg5[%50, %c0_26] : memref<16x128xf32, #tpu.memory_space<vmem>>, vector<16x128xf32>
    tpu.vector_store %arg5[%50, %c0_26], %49 {strides = array<i32>} : memref<16x128xf32, #tpu.memory_space<vmem>>, vector<16x128xf32>,
    %c1_i32_27 = arith.constant 1 : i32
    return
  }
  func.func @transform_1(%arg0: i32, %arg1: memref<16xi32, #tpu.memory_space<smem>>) -> (i32, i32) {
    %c0_i32 = arith.constant 0 : i32
    %c0_i32_0 = arith.constant 0 : i32
    %c0_i32_1 = arith.constant 0 : i32
    return %c0_i32, %c0_i32_0 : i32, i32
  }
  func.func @transform_2(%arg0: i32, %arg1: memref<16xi32, #tpu.memory_space<smem>>) -> (i32, i32) {
    %c0_i32 = arith.constant 0 : i32
    %c0_i32_0 = arith.constant 0 : i32
    %c0_i32_1 = arith.constant 0 : i32
    return %c0_i32, %c0_i32_0 : i32, i32
  }
  func.func @transform_3(%arg0: i32, %arg1: memref<16xi32, #tpu.memory_space<smem>>) -> (i32, i32) {
    %c0_i32 = arith.constant 0 : i32
    %c0_i32_0 = arith.constant 0 : i32
    return %arg0, %c0_i32 : i32, i32
  }
}

</mosaic_0001>

<bundles_post_ra>
// kernel: tpu_custom_call.1
= control target key start
LH: loop header
LB: loop body
LE: loop exit
PB: predicated region body
PF: predicated region fallthrough
CT: control target
= control target key end

     0   :  { %s267_s18 = smov [#allocation4]   ;;  %s336_s0 = inlined_call_operand.hbm [shape: s32[16], index: 0, kind: input, shape index: {}]   ;;  %s337_s1 = inlined_call_operand.hbm [shape: f32[16,128], index: 1, kind: input, shape index: {}]   ;;  %s338_s2 = inlined_call_operand.vmem [shape: f32[1,128], index: 2, kind: input, shape index: {}]   ;;  %s339_s3 = inlined_call_operand.vmem [shape: f32[1,128], index: 3, kind: input, shape index: {}]   ;;  %s340_s4 = inlined_call_operand.hbm [shape: f32[16,128], index: 4, kind: output, shape index: {}]  }
   0x1   :  { %s10_s17 = sshll.u32 %s336_s0, 4  ;;  %s11_s17 = int_to_ptr.hbm [resolvable:$true] %s10_s17 }
   0x2   :  { %13 = dma.hbm_to_smem %s11_s17, 16, %s267_s18, [#allocation3] }
   0x3   :  { %253 = dma.done.wait [#allocation3], 16 }
   0x4   :  { %254 = vsyncadd [#allocation3], 4294967280 }
   0x5   :  { %16 = sfence }
   0x6   :  { %17 = vsyncpa [#allocation6], 0  ;;  %s300_s19 = smov 0  }
   0x7 LB: > { %s30_s20 = sld [smem:[#allocation4 + %s261_s19]]  ;;  %s32_s21 = scalar_lea.vmem [#allocation5], %s261_s19  ;;  %s261_s19 = sphi %s300_s19, %s28_s19  }
   0x8   : > { %s42_s22 = sshll.u32 %s32_s21, 4  ;;  %s201_s30 = scalar_lea.hbm %s337_s1, 16  ;;  %s43_s22 = int_to_ptr.vmem [resolvable:$true] %s42_s22 }
   0xd   : > { %s31_s24 = scalar_lea.hbm %s337_s1, %s30_s20 }
   0xe   : > { %s40_s25 = sshll.u32 %s31_s24, 4  ;;  %s41_s25 = int_to_ptr.hbm [resolvable:$true] %s40_s25 }
   0xf   : > { %s197_s26 = sshra.s32 %s41_s25, 4  ;;  %s198_s26 = int_to_ptr.hbm [resolvable:$true] %s197_s26 }
  0x10   : > { %s199_s27 = scalar_lea.hbm %s198_s26, 1  ;;  %p202_p1 = scmp.lt.s32.totalorder %s198_s26, %s337_s1 }
  0x11   : > { %p200_p0 = scmp.ne.s32.totalorder %s198_s26, %s199_s27  ;;  %p203_p2 = scmp.lt.s32.totalorder %s201_s30, %s199_s27 }
  0x13   : > { %p204_p3 = por %p203_p2, %p202_p1 }
  0x15   : > { %p205_p4 = pnand %p204_p3, %p200_p0 }
  0x17   : > { %208 = shalt.err (!%p205_p4)  }
  0x18   : > { %s209_s7 = sshra.s32 %s43_s22, 4  ;;  %s268_s9 = smov [#allocation5]   ;;  %s210_s7 = int_to_ptr.vmem [resolvable:$true] %s209_s7 }
  0x19   : > { %s211_s8 = scalar_lea.vmem %s210_s7, 1  ;;  %s213_s10 = scalar_lea.vmem %s268_s9, 16 }
  0x1a   : > { %p212_p5 = scmp.ne.s32.totalorder %s210_s7, %s211_s8  ;;  %p214_p6 = scmp.lt.s32.totalorder %s210_s7, [#allocation5] }
  0x1b   : > { %p215_p7 = scmp.lt.s32.totalorder %s213_s10, %s211_s8 }
  0x1d   : > { %p216_p8 = por %p215_p7, %p214_p6 }
  0x1f   : > { %p217_p9 = pnand %p216_p8, %p212_p5 }
  0x21   : > { %220 = shalt.err (!%p217_p9)  }
  0x22   : > { %45 = dma.hbm_to_vmem [thread:$0]  %s41_s25, 16, %s43_s22, [#allocation2] }
  0x23   : > { %s28_s19 = sadd.s32 1, %s261_s19  }
  0x24   : > { %p25_p10 = scmp.ge.s32.totalorder %s28_s19, 16  }
  0x25   :  { %v322_v0 = vld [vmem:[%s338_s2] sm:$0x1] (%p25_p10)  ;;  %v48_v2 = vlaneseq (%p25_p10)  ;;  %s263_s15 = smov (%p25_p10), 0  }
  0x26   :  { %27 = sbr.rel (!%p25_p10) target bundleno = 7 (0x7), region = 49  ;;  %v327_v1 = vld [vmem:[%s339_s3] sm:$0x1] (%p25_p10) }
  0x27   :  { %v49_v3 = vand.u32 (%p25_p10), 127, %v48_v2 }
  0x29   :  { %vm50_vm0 = vcmp.lt.s32.totalorder (%p25_p10), %v49_v3, 32 }
  0x2b LB: > { %255 = dma.done.wait [#allocation2], 16  ;;  %s265_s15 = sphi %s263_s15, %s56_s15  }
  0x2c   : > { %256 = vsyncadd [#allocation2], 4294967280  ;;  %s56_s15 = sadd.s32 1, %s265_s15  }
  0x2d   : > { %p53_p11 = scmp.ge.s32.totalorder %s56_s15, 16  }
  0x2e   :  { %v60_v4 = vld [vmem:[#allocation5] sm:$0xff] (%p53_p11)  ;;  %v61_v5 = vld [vmem:[#allocation5 + $0x8] sm:$0xff] (%p53_p11)  ;;  %v105_v30 = vperm.slane (%p53_p11), %v322_v0, 0  ;;  %v110_v34 = vperm.slane (%p53_p11), %v327_v1, 0  ;;  %s269_s1 = smov (%p53_p11), [#allocation5]   ;;  %s122_s17 = sshll.u32 (%p53_p11), %s340_s4, 4  ;;  %s123_s17 = int_to_ptr.hbm [resolvable:$true] %s122_s17 }
  0x2f   :  { %55 = sbr.rel (!%p53_p11) target bundleno = 43 (0x2b), region = 60  ;;  %62 = vadd.xlane.f32.xlu0 (%p53_p11), %v60_v4  ;;  %s120_s2 = sshll.u32 (%p53_p11), %s269_s1, 4  ;;  %s121_s2 = int_to_ptr.vmem [resolvable:$true] %s120_s2 }
  0x30   :  { %s270_s18 = smov (%p53_p11), 128   ;;  %s271_s19 = smov (%p53_p11), 8  }
  0x37   :  { %64 = vadd.xlane.f32.xlu0 %v61_v5 }
  0xa2   :  { %v63_v6 = vpop.xlane.xlu0 %62 }
  0xa3   :  { %v66_v7 = vmul.f32 0.03125, %v63_v6 }
  0xa5   :  { %v68_v8 = vsub.f32 %v60_v4, %v66_v7 }
  0xa7   :  { %v70_v9 = vsel %vm50_vm0, %v68_v8, 0.0 }
  0xa8   :  { %v72_v10 = vmul.f32 %v70_v9, %v70_v9 }
  0xaa   :  { %74 = vadd.xlane.f32.xlu1 %v72_v10  ;;  %v65_v11 = vpop.xlane.xlu0 %64 }
  0xab   :  { %v67_v12 = vmul.f32 0.03125, %v65_v11 }
  0xad   :  { %v69_v13 = vsub.f32 %v61_v5, %v67_v12 }
  0xaf   :  { %v71_v14 = vsel %vm50_vm0, %v69_v13, 0.0 }
  0xb0   :  { %v73_v15 = vmul.f32 %v71_v14, %v71_v14 }
  0xb2   :  { %76 = vadd.xlane.f32.xlu1 %v73_v15 }
 0x11d   :  { %v75_v16 = vpop.xlane.xlu1 %74 }
 0x11e   :  { %v78_v17 = vmul.f32 0.03125, %v75_v16 }
 0x120   :  { %v80_v18 = vadd.f32 1e-05, %v78_v17 }
 0x122   :  { %181 = vrsqrt.f32 %v80_v18  ;;  %vm88_vm2 = vweird.f32 %v80_v18 }
 0x125   :  { %v77_v19 = vpop.xlane.xlu1 %76 }
 0x126   :  { %v79_v20 = vmul.f32 0.03125, %v77_v19 }
 0x128   :  { %v182_v21 = vpop.eup %181  ;;  %v81_v22 = vadd.f32 1e-05, %v79_v20 }
 0x129   :  { %v83_v23 = vmul.f32 %v182_v21, %v80_v18  ;;  %vm89_vm1 = vweird.f32 %v182_v21 }
 0x12a   :  { %183 = vrsqrt.f32 %v81_v22  ;;  %vm90_vm3 = vmor %vm88_vm2, %vm89_vm1  ;;  %vm98_vm5 = vweird.f32 %v81_v22 }
 0x12b   :  { %v84_v24 = vmul.f32 %v182_v21, %v83_v23 }
 0x12d   :  { %v85_v25 = vmul.f32 0.5, %v84_v24 }
 0x12f   :  { %v86_v26 = vsub.f32 1.5, %v85_v25 }
 0x130   :  { %v184_v27 = vpop.eup %183 }
 0x131   :  { %v87_v28 = vmul.f32 %v182_v21, %v86_v26  ;;  %v93_v29 = vmul.f32 %v184_v27, %v81_v22  ;;  %vm99_vm4 = vweird.f32 %v184_v27 }
 0x132   :  { %vm100_vm6 = vmor %vm98_vm5, %vm99_vm4 }
 0x133   :  { %v91_v31 = vsel %vm90_vm3, %v182_v21, %v87_v28  ;;  %v94_v32 = vmul.f32 %v184_v27, %v93_v29 }
 0x134   :  { %v102_v33 = vmul.f32 %v91_v31, %v70_v9 }
 0x135   :  { %v95_v35 = vmul.f32 0.5, %v94_v32 }
 0x136   :  { %v107_v36 = vmul.f32 %v105_v30, %v102_v33 }
 0x137   :  { %v96_v37 = vsub.f32 1.5, %v95_v35 }
 0x138   :  { %v112_v38 = vadd.f32 %v110_v34, %v107_v36 }
 0x139   :  { %v97_v39 = vmul.f32 %v184_v27, %v96_v37 }
 0x13a   :  { %114 = vst [vmem:[#allocation5] sm:$0xff] %v112_v38 }
 0x13b   :  { %v101_v40 = vsel %vm100_vm6, %v184_v27, %v97_v39 }
 0x13c   :  { %v103_v41 = vmul.f32 %v101_v40, %v71_v14 }
 0x13e   :  { %v108_v42 = vmul.f32 %v105_v30, %v103_v41 }
 0x140   :  { %v113_v43 = vadd.f32 %v110_v34, %v108_v42 }
 0x142   :  { %115 = vst [vmem:[#allocation5 + $0x8] sm:$0xff] %v113_v43 }
 0x143   :  { %128 = dma.vmem_to_hbm [thread:$0]  %s121_s2, 256, %s123_s17, [#allocation6], %s270_s18, %s270_s18, %s271_s19  }
 0x144   :  { %257 = dma.done.wait [#allocation6], 256  }
 0x145   :  { %258 = vsyncadd [#allocation6], 4294967040 }
 0x146   :  { %133 = vsyncpa [#allocation6], 1 }
 0x147   :  { %134 = vsyncmov [#allocation2] }
 0x14a   :  { %s135_s20 = vpop.sfrf %134 }
 0x14b   :  { %p159_p12 = scmp.ne.s32.totalorder %s135_s20, 0 }
 0x14d   :  { %139 = shalt.err (%p159_p12)  }
 0x14e   :  { %141 = vsyncmov [#allocation2 + $0x1] }
 0x151   :  { %s142_s21 = vpop.sfrf %141 }
 0x152   :  { %p160_p13 = scmp.ne.s32.totalorder %s142_s21, 0 }
 0x154   :  { %146 = shalt.err (%p160_p13)  }

</bundles_post_ra>
